<compile_context>
chip_gen: v7x
topology: tpu7x:2x2x1
jax: 0.10.0
libtpu: 0.0.40
codegen_flags: <defaults>
</compile_context>

<pallas_src>
import functools
import math

import jax
import jax.numpy as jnp
from jax import lax
from jax.experimental import pallas as pl
from jax.experimental.pallas import tpu as pltpu

EPS = 1e-12  # F.normalize default eps: x / max(||x||_2, eps)


def _round_up(x, m):
    return ((x + m - 1) // m) * m


# --------------------------------------------------------------------------
# Kernel A: dense linear (+bias) followed by row-wise L2 normalization.
# --------------------------------------------------------------------------
def _dense_normalize_kernel(x_ref, w_ref, b_ref, o_ref):
    # x: (tb, Din)  w: (Din, E)  b: (1, E)  o: (tb, E)
    emb = jnp.dot(x_ref[...], w_ref[...], preferred_element_type=jnp.float32)
    emb = emb + b_ref[...]
    sumsq = jnp.sum(emb * emb, axis=-1, keepdims=True)
    # rsqrt(max(||x||^2, eps^2)) == 1 / max(||x||, eps)  (sqrt is monotone)
    inv = lax.rsqrt(jnp.maximum(sumsq, EPS * EPS))
    o_ref[...] = (emb * inv).astype(o_ref.dtype)


def dense_l2_normalize(x, dense_w, dense_b, *, tb=128, compute_dtype=jnp.float32):
    """x: (B, Din); dense_w: PyTorch layout (E, Din); dense_b: (E,).
    Returns L2-row-normalized dense output, (B, E), dtype=compute_dtype."""
    B, Din = x.shape
    E, Din2 = dense_w.shape
    assert Din == Din2 and dense_b.shape == (E,)

    tb = min(tb, _round_up(B, 8))
    Bp = _round_up(B, tb)

    xp = jnp.pad(x, ((0, Bp - B), (0, 0))).astype(compute_dtype)
    wt = dense_w.T.astype(compute_dtype)            # (Din, E): contraction dim leading
    b2 = dense_b.reshape(1, E).astype(jnp.float32)  # f32 bias added post-accumulation

    out = pl.pallas_call(
        _dense_normalize_kernel,
        out_shape=jax.ShapeDtypeStruct((Bp, E), compute_dtype),
        grid_spec=pltpu.PrefetchScalarGridSpec(
            num_scalar_prefetch=0,
            grid=(Bp // tb,),
            in_specs=[
                pl.BlockSpec((tb, Din), lambda i: (i, 0)),
                pl.BlockSpec((Din, E), lambda i: (0, 0)),
                pl.BlockSpec((1, E), lambda i: (0, 0)),
            ],
            out_specs=pl.BlockSpec((tb, E), lambda i: (i, 0)),
        ),
        compiler_params=pltpu.CompilerParams(
            dimension_semantics=("parallel",),
            vmem_limit_bytes=48 * 1024 * 1024,
        ),
    )(xp, wt, b2)
    return out[:B]


# --------------------------------------------------------------------------
# Kernel B: ArcMarginProduct on pre-normalized features / weights.
# --------------------------------------------------------------------------
def _arc_margin_kernel(fn_ref, wnt_ref, lab_ref, o_ref, *,
                       s, cos_m, sin_m, th, mm, ls_eps, easy_margin,
                       tc, num_classes):
    # fn: (tb, D) L2-normalized rows; wnt: (D, tc) L2-normalized classes (transposed);
    # lab: (tb, 1) int32; o: (tb, tc)
    cosine = jnp.dot(fn_ref[...], wnt_ref[...], preferred_element_type=jnp.float32)
    sine = jnp.sqrt(jnp.maximum(1.0 - cosine * cosine, 0.0))
    phi = cosine * cos_m - sine * sin_m
    if easy_margin:
        phi = jnp.where(cosine > 0.0, phi, cosine)
    else:
        phi = jnp.where(cosine > th, phi, cosine - mm)

    # one-hot for this class tile: global class index of each column.
    col = lax.broadcasted_iota(jnp.int32, cosine.shape, 1) + pl.program_id(1) * tc
    one_hot = (col == lab_ref[...]).astype(jnp.float32)  # (tb,1) broadcasts over lanes
    if ls_eps > 0.0:
        one_hot = (1.0 - ls_eps) * one_hot + ls_eps / num_classes

    out = one_hot * phi + (1.0 - one_hot) * cosine
    o_ref[...] = (out * s).astype(o_ref.dtype)


def arc_margin_product(features_n, labels, weight_nt, *, s, m, easy_margin, ls_eps,
                       num_classes, tb=128, tc=256, out_dtype=jnp.float32):
    """features_n: (B, D) already L2-row-normalized.
    weight_nt: (D, C) already L2-normalized per class and transposed."""
    B, D = features_n.shape
    D2, C = weight_nt.shape
    assert D == D2 and C == num_classes

    tb = min(tb, _round_up(B, 8))
    tc = min(tc, _round_up(C, 128))
    Bp = _round_up(B, tb)
    Cp = _round_up(C, tc)

    f = jnp.pad(features_n, ((0, Bp - B), (0, 0)))
    w = jnp.pad(weight_nt, ((0, 0), (0, Cp - C)))
    lab = jnp.pad(labels.astype(jnp.int32), (0, Bp - B)).reshape(Bp, 1)

    cos_m = math.cos(m)
    sin_m = math.sin(m)
    th = math.cos(math.pi - m)
    mm = math.sin(math.pi - m) * m

    kernel = functools.partial(
        _arc_margin_kernel, s=s, cos_m=cos_m, sin_m=sin_m, th=th, mm=mm,
        ls_eps=ls_eps, easy_margin=easy_margin, tc=tc, num_classes=num_classes)

    out = pl.pallas_call(
        kernel,
        out_shape=jax.ShapeDtypeStruct((Bp, Cp), out_dtype),
        grid_spec=pltpu.PrefetchScalarGridSpec(
            num_scalar_prefetch=0,
            grid=(Bp // tb, Cp // tc),
            in_specs=[
                pl.BlockSpec((tb, D), lambda i, j: (i, 0)),   # feature batch tile
                pl.BlockSpec((D, tc), lambda i, j: (0, j)),   # normalized weight class tile
                pl.BlockSpec((tb, 1), lambda i, j: (i, 0)),   # labels for this batch tile
            ],
            out_specs=pl.BlockSpec((tb, tc), lambda i, j: (i, j)),
        ),
        compiler_params=pltpu.CompilerParams(
            dimension_semantics=("parallel", "parallel"),
            vmem_limit_bytes=48 * 1024 * 1024,
        ),
    )(f, w, lab)
    return out[:B, :C]


# --------------------------------------------------------------------------
# CLIPModel.forward starting from backbone features.
# --------------------------------------------------------------------------
def clip_model_forward(backbone_features, labels, dense_w, dense_b, fc_weight, *,
                       s=30.0, m=0.5, easy_margin=False, ls_eps=0.0,
                       compute_dtype=jnp.float32, tb=128, tc=256):
    # TODO(synk): the frozen pretrained CLIP backbone, the image Resize/Normalize
    # preprocessing, and training-mode Dropout (identity at inference) are not
    # implemented here; this starts from the backbone's pooled features.
    feats_n = dense_l2_normalize(backbone_features, dense_w, dense_b,
                                 tb=tb, compute_dtype=compute_dtype)
    C, D = fc_weight.shape
    # pre-normalize + pre-transpose the ArcFace weight once (wrapper/XLA side).
    wn = fc_weight / jnp.maximum(jnp.linalg.norm(fc_weight, axis=1, keepdims=True), EPS)
    wnt = wn.T.astype(compute_dtype)  # (D, C): contraction dim leading for the MXU
    return arc_margin_product(feats_n, labels, wnt, s=s, m=m, easy_margin=easy_margin,
                              ls_eps=ls_eps, num_classes=C, tb=tb, tc=tc)


# --------------------------------------------------------------------------
# Pure-JAX reference of the exact PyTorch semantics (eval mode).
# --------------------------------------------------------------------------
def _reference_forward(x, labels, dense_w, dense_b, fc_w, *, s, m, easy_margin, ls_eps):
    n_cls = fc_w.shape[0]
    emb = x @ dense_w.T + dense_b
    fn = emb / jnp.maximum(jnp.linalg.norm(emb, axis=1, keepdims=True), EPS)
    wn = fc_w / jnp.maximum(jnp.linalg.norm(fc_w, axis=1, keepdims=True), EPS)
    cosine = fn @ wn.T
    sine = jnp.sqrt(jnp.maximum(1.0 - cosine * cosine, 0.0))
    phi = cosine * math.cos(m) - sine * math.sin(m)
    if easy_margin:
        phi = jnp.where(cosine > 0.0, phi, cosine)
    else:
        phi = jnp.where(cosine > math.cos(math.pi - m), phi,
                        cosine - math.sin(math.pi - m) * m)
    one_hot = jax.nn.one_hot(labels, n_cls, dtype=jnp.float32)
    if ls_eps > 0.0:
        one_hot = (1.0 - ls_eps) * one_hot + ls_eps / n_cls
    return (one_hot * phi + (1.0 - one_hot) * cosine) * s


if __name__ == "__main__":
    batch = 12          # ragged vs tb=8 -> exercises batch padding
    clip_dim = 64       # clip_models_output_dims[opts.model_name]
    emb_dim = 32        # opts.raw_embedding_size
    n_cls = 200         # ragged vs tc=128 -> exercises class padding
    s, m, easy_margin, ls_eps = 30.0, 0.5, False, 0.1

    key = jax.random.PRNGKey(0)
    kf, kl, kdw, kdb, kfc = jax.random.split(key, 5)

    backbone_feats = jax.random.normal(kf, (batch, clip_dim), dtype=jnp.float32)
    labels = jax.random.randint(kl, (batch,), 0, n_cls)

    # nn.Linear-style init for the dense head (PyTorch weight layout: (out, in)).
    lim = 1.0 / math.sqrt(clip_dim)
    dense_w = jax.random.uniform(kdw, (emb_dim, clip_dim), dtype=jnp.float32,
                                 minval=-lim, maxval=lim)
    dense_b = jax.random.uniform(kdb, (emb_dim,), dtype=jnp.float32,
                                 minval=-lim, maxval=lim)
    # xavier_uniform_ for the ArcMarginProduct weight (n_cls, emb_dim).
    gain = math.sqrt(6.0 / (n_cls + emb_dim))
    fc_w = jax.random.uniform(kfc, (n_cls, emb_dim), dtype=jnp.float32,
                              minval=-gain, maxval=gain)

    # f32 compute path: strict correctness check against the plain-JAX reference.
    out = clip_model_forward(backbone_feats, labels, dense_w, dense_b, fc_w,
                             s=s, m=m, easy_margin=easy_margin, ls_eps=ls_eps,
                             compute_dtype=jnp.float32, tb=8, tc=128)
    out = jax.block_until_ready(out)
    ref = _reference_forward(backbone_feats, labels, dense_w, dense_b, fc_w,
                             s=s, m=m, easy_margin=easy_margin, ls_eps=ls_eps)
    assert out.shape == (batch, n_cls), out.shape
    assert jnp.allclose(out, ref, atol=2e-2, rtol=2e-3), float(jnp.abs(out - ref).max())

    # bf16 MXU-input path (recommended on v6e/v7x): run + sanity check.
    out_bf16 = clip_model_forward(backbone_feats, labels, dense_w, dense_b, fc_w,
                                  s=s, m=m, easy_margin=easy_margin, ls_eps=ls_eps,
                                  compute_dtype=jnp.bfloat16, tb=8, tc=128)
    out_bf16 = jax.block_until_ready(out_bf16)
    assert out_bf16.shape == (batch, n_cls)
    assert bool(jnp.all(jnp.isfinite(out_bf16)))

    print("KERNEL_OK")
</pallas_src>

<mosaic_0001>
module attributes {stable_mosaic.version = 11 : i64} {
  func.func @_dense_normalize_kernel(%arg0: i32, %arg1: memref<8x64xf32, #tpu.memory_space<vmem>>, %arg2: memref<64x32xf32, #tpu.memory_space<vmem>>, %arg3: memref<1x32xf32, #tpu.memory_space<vmem>>, %arg4: memref<8x32xf32, #tpu.memory_space<vmem>>) attributes {dimension_semantics = [#tpu.dimension_semantics<parallel>], iteration_bounds = array<i64: 2>, scalar_prefetch = 0 : i64, scratch_operands = 0 : i64, tpu.core_type = #tpu.core_type<tc>, window_params = [{transform_indices = @transform_0, window_bounds = array<i64: 8, 64>}, {pipeline_mode = #tpu.pipeline_mode<synchronous>, transform_indices = @transform_1, window_bounds = array<i64: 64, 32>}, {pipeline_mode = #tpu.pipeline_mode<synchronous>, transform_indices = @transform_2, window_bounds = array<i64: 1, 32>}, {transform_indices = @transform_3, window_bounds = array<i64: 8, 32>}]} {
    %c0 = arith.constant 0 : index
    %c0_0 = arith.constant 0 : index
    %0 = vector.load %arg1[%c0, %c0_0] : memref<8x64xf32, #tpu.memory_space<vmem>>, vector<8x64xf32>
    %c0_1 = arith.constant 0 : index
    %c0_2 = arith.constant 0 : index
    %1 = vector.load %arg2[%c0_1, %c0_2] : memref<64x32xf32, #tpu.memory_space<vmem>>, vector<64x32xf32>
    %cst = arith.constant dense<0.000000e+00> : vector<8x32xf32>
    %2 = tpu.matmul %0, %1, %cst {dimension_numbers = #tpu.dot_dimension_numbers<[1], [0], [0], [1], [0, 0, 1, 1], [], []>} : vector<8x64xf32>, vector<64x32xf32>, vector<8x32xf32> -> vector<8x32xf32>
    %c0_3 = arith.constant 0 : index
    %c0_4 = arith.constant 0 : index
    %3 = vector.load %arg3[%c0_3, %c0_4] : memref<1x32xf32, #tpu.memory_space<vmem>>, vector<1x32xf32>
    %4 = vector.broadcast %3 : vector<1x32xf32> to vector<8x32xf32>
    %5 = arith.addf %2, %4 : vector<8x32xf32>
    %6 = arith.mulf %5, %5 : vector<8x32xf32>
    %cst_5 = arith.constant dense<0.000000e+00> : vector<8xf32>
    %7 = vector.multi_reduction <add>, %6, %cst_5 [1] : vector<8x32xf32> to vector<8xf32>
    %8 = vector.shape_cast %7 : vector<8xf32> to vector<8x1xf32>
    %cst_6 = arith.constant 1.000000e-24 : f32
    %9 = vector.broadcast %cst_6 : f32 to vector<8x1xf32>
    %10 = arith.maximumf %8, %9 : vector<8x1xf32>
    %11 = math.rsqrt %10 : vector<8x1xf32>
    %12 = vector.broadcast %11 : vector<8x1xf32> to vector<8x32xf32>
    %13 = arith.mulf %5, %12 : vector<8x32xf32>
    %c0_7 = arith.constant 0 : index
    %c0_8 = arith.constant 0 : index
    %14 = vector.load %arg4[%c0_7, %c0_8] : memref<8x32xf32, #tpu.memory_space<vmem>>, vector<8x32xf32>
    tpu.vector_store %arg4[%c0_7, %c0_8], %13 {strides = array<i32>} : memref<8x32xf32, #tpu.memory_space<vmem>>, vector<8x32xf32>,
    return
  }
  func.func @transform_0(%arg0: i32) -> (i32, i32) {
    %c0_i32 = arith.constant 0 : i32
    %c0_i32_0 = arith.constant 0 : i32
    return %arg0, %c0_i32 : i32, i32
  }
  func.func @transform_1(%arg0: i32) -> (i32, i32) {
    %c0_i32 = arith.constant 0 : i32
    %c0_i32_0 = arith.constant 0 : i32
    %c0_i32_1 = arith.constant 0 : i32
    return %c0_i32, %c0_i32_0 : i32, i32
  }
  func.func @transform_2(%arg0: i32) -> (i32, i32) {
    %c0_i32 = arith.constant 0 : i32
    %c0_i32_0 = arith.constant 0 : i32
    %c0_i32_1 = arith.constant 0 : i32
    return %c0_i32, %c0_i32_0 : i32, i32
  }
  func.func @transform_3(%arg0: i32) -> (i32, i32) {
    %c0_i32 = arith.constant 0 : i32
    %c0_i32_0 = arith.constant 0 : i32
    return %arg0, %c0_i32 : i32, i32
  }
}

</mosaic_0001>

<bundles_post_ra>
// kernel: tpu_custom_call.1
= control target key start
LH: loop header
LB: loop body
LE: loop exit
PB: predicated region body
PF: predicated region fallthrough
CT: control target
= control target key end

     0   :  { %8 = vsyncpa [#allocation3], 0  ;;  %s651_s0 = inlined_call_operand.vmem [shape: f32[16,64], index: 0, kind: input, shape index: {}]   ;;  %s652_s1 = inlined_call_operand.vmem [shape: f32[64,32], index: 1, kind: input, shape index: {}]   ;;  %s653_s2 = inlined_call_operand.vmem [shape: f32[1,32], index: 2, kind: input, shape index: {}]   ;;  %s654_s3 = inlined_call_operand.hbm [shape: f32[16,32], index: 3, kind: output, shape index: {}]  }
   0x1   :  { %10 = vsyncpa [#allocation3 + $0x1], 0  ;;  %s522_s12 = smov 0   ;;  %s524_s13 = smov 0  }
   0x2   :  { %s526_s14 = smov 0   ;;  %s528_s15 = smov 0  }
   0x3 LB: > { %s543_s16 = sadd.s32 4294967295, %s496_s15   ;;  %s338_s17 = sadd.s32 4294967294, %s496_s15   ;;  %s496_s15 = sphi %s528_s15, %s660_s15   ;;  %s492_s14 = sphi %s526_s14, %s659_s14   ;;  %s488_s13 = sphi %s524_s13, %s658_s13   ;;  %s484_s12 = sphi %s522_s12, %s657_s12  }
   0x4   : > { %s547_s18 = sadd.s32 1, %s496_s15   ;;  %s91_s19 = sadd.s32 1, %s492_s14 }
   0x5   : > { %s88_s20 = ssub.s32 %s496_s15, %s547_s18  ;;  %p101_p0 = scmp.ne.s32.totalorder %s492_s14, %s488_s13 }
   0x6   : > { %p89_p1 = scmp.eq.s32.totalorder %s88_s20, 0  ;;  %p102_p2 = scmp.eq.s32.totalorder %s543_s16, 1 }
   0x7   : > { %p107_p3 = scmp.ne.s32.totalorder %s488_s13, %s484_s12  ;;  %p108_p4 = scmp.eq.s32.totalorder %s338_s17, 1 }
   0x8   : > { %s558_s21 = scalar_select %p89_p1, %s492_s14, %s91_s19  }
   0x9   : > { %p560_p5 = por %p102_p2, %p101_p0  ;;  %p564_p6 = por %p108_p4, %p107_p3 }
   0xa   : > { %p341_p7 = scmp.ge.s32.totalorder %s496_s15, 1  ;;  %p139_p8 = scmp.lt.s32.totalorder %s496_s15, 3 }
   0xc   : > { %p140_p9 = pnand %p341_p7, %p139_p8 }
   0xd   : > { %v167_v0 = vld [vmem:[%s652_s1] sm:$0xff] (!%p140_p9)  ;;  %v168_v1 = vld [vmem:[%s652_s1 + $0x8] sm:$0xff] (!%p140_p9)  ;;  %v169_v2 = vld [vmem:[%s652_s1 + $0x10] sm:$0xff] (!%p140_p9)  ;;  %v498_v3 = vmov (!%p140_p9), 0.0|0.0   ;;  %vm499_vm0 = vmmov (!%p140_p9), 0   ;;  %v500_v6 = vmov (!%p140_p9), 0.0  }
   0xe   : > { %143 = sbr.rel (%p140_p9) target bundleno = 419 (0x1a3), region = 32  ;;  %378 = vmatprep.subr.bf16.mxu0 (!%p140_p9), %v498_v3  ;;  %v379_v4 = vpack.c.bf16 (!%p140_p9), %v168_v1, %v167_v0  ;;  %v170_v5 = vld [vmem:[%s652_s1 + $0x18] sm:$0xff] (!%p140_p9)  ;;  %375 = vmatprep.mubr.msk.f32.mxu0 (!%p140_p9), %vm499_vm0, %v500_v6  ;;  %p162_p10 = scmp.lt.s32.totalorder (!%p140_p9), %s543_s16, 1  ;;  %v171_v8 = vld [vmem:[%s652_s1 + $0x20] sm:$0xff] (!%p140_p9)  ;;  %v172_v9 = vld [vmem:[%s652_s1 + $0x28] sm:$0xff] (!%p140_p9)  ;;  %vm182_vm1 = vcmask (!%p140_p9), 523264  }
   0xf   : > { %v382_v7 = vpack.c.bf16 (!%p140_p9), %v170_v5, %v169_v2  ;;  %v385_v10 = vpack.c.bf16 (!%p140_p9), %v172_v9, %v171_v8  ;;  %v173_v11 = vld [vmem:[%s652_s1 + $0x30] sm:$0xff] (!%p140_p9)  ;;  %v174_v12 = vld [vmem:[%s652_s1 + $0x38] sm:$0xff] (!%p140_p9)  ;;  %v344_v15 = vld [vmem:[%s653_s2] ss:$0 sm:$0xff] (!%p140_p9)  ;;  %vm257_vm2 = vcmask (!%p140_p9), 261120   ;;  %s159_s29 = sand.u32 (!%p140_p9), 1, %s488_s13  }
  0x10   : > { %380 = vmatpush3.bf16.msra.mxu0 (!%p140_p9), %v379_v4  ;;  %v388_v13 = vpack.c.bf16 (!%p140_p9), %v174_v12, %v173_v11  ;;  %s342_s30 = sshll.u32 (!%p140_p9), %s159_s29, 3  ;;  %s347_s4 = sshll.u32 (!%p140_p9), %s543_s16, 7 }
  0x11   : > { %381 = vmatprep.subr.bf16.mxu0 (!%p140_p9), %v498_v3  ;;  %s161_s5 = scalar_lea.vmem (!%p140_p9), [#allocation2], %s342_s30  ;;  %s266_s10 = scalar_lea.sflag (!%p140_p9), [#allocation3], %s159_s29 }
  0x12   : > { %s279_s6 = sshll.u32 (!%p140_p9), %s161_s5, 4  ;;  %s610_s6 = int_to_ptr.vmem [resolvable:$true] %s279_s6 }
  0x13   : > { %s434_s11 = scalar_lea.vmem (!%p140_p9), %s610_s6, 128 }
  0x14   : > { %383 = vmatpush3.bf16.msra.mxu0 (!%p140_p9), %v382_v7  ;;  %p435_p11 = scmp.ne.s32.totalorder (!%p140_p9), %s610_s6, %s434_s11 }
  0x15   : > { %s163_s9 = scalar_select %p162_p10, %s543_s16, 1  ;;  %384 = vmatprep.subr.bf16.mxu0 %v498_v3 }
  0x16   : > { %p436_p12 = pnand %p435_p11, %p560_p5  ;;  %s501_s16 = smov [#allocation2]  }
  0x17   : > { %s343_s20 = sshll.u32 %s163_s9, 3  ;;  %s608_s9 = scalar_lea.hbm %s654_s3, %s347_s4 }
  0x18   : > { %386 = vmatpush3.bf16.msra.mxu0 %v385_v10  ;;  %s165_s26 = scalar_lea.vmem %s651_s0, %s343_s20  ;;  %p437_p13 = pneg %p436_p12 }
  0x19   : > { %387 = vmatprep.subr.bf16.mxu0 %v498_v3  ;;  %v166_v14 = vld [vmem:[%s165_s26] sm:$0xff]  ;;  %s438_s17 = sshll.u32 %s501_s16, 4  ;;  %s439_s17 = int_to_ptr.vmem [resolvable:$false] %s438_s17 }
  0x1a   : > { %s440_s19 = scalar_lea.vmem %s439_s17, 256  ;;  %p441_p0 = scmp.lt.s32.totalorder %s610_s6, %s439_s17 }
  0x1b   : > { %p442_p1 = scmp.lt.s32.totalorder %s440_s19, %s434_s11 }
  0x1c   : > { %389 = vmatpush3.bf16.msra.mxu0 %v388_v13 }
  0x1d   : > { %p443_p2 = por %p442_p1, %p441_p0 }
  0x1f   : > { %376 = vmatmul.mubr.msk.f32.vlgmr.msra.gmra.mrb[0].mxu0 %vm182_vm1, %v166_v14  ;;  %p444_p3 = pnand %p443_p2, %p437_p13 }
  0xf2   : > { %v252_v16 = vpop.f32.mrb[0].mxu0 }
  0xf3   : > { %v253_v17 = vadd.f32 %v344_v15, %v252_v16  ;;  %v377_v18 = vpop.f32.mrb[1].mxu0 }
  0xf5   : > { %v256_v19 = vmul.f32 %v253_v17, %v253_v17 }
  0xf7   : > { %v258_v20 = vsel %vm257_vm2, %v256_v19, 0.0 }
  0xf8   : > { %259 = vadd.xlane.f32.xlu0 %v258_v20 }
 0x185   : > { %v260_v21 = vpop.xlane.xlu0 %259 }
 0x186   : > { %v261_v22 = vmax.f32 %v260_v21, 1e-24 }
 0x188   : > { %432 = vrsqrt.f32 %v261_v22 }
 0x192   : > { %v433_v23 = vpop.eup %432 }
 0x193   : > { %v263_v24 = vmul.f32 %v433_v23, %v253_v17 }
 0x195   : > { %264 = vst.msk [vmem:[%s161_s5] sm:$0xff] %vm257_vm2, %v263_v24 }
 0x196   : > { %447 = shalt.err (!%p444_p3)
}
 0x197   : > { %s448_s20 = scalar_lea.hbm %s608_s9, 128  ;;  %s452_s26 = scalar_lea.hbm %s654_s3, 256 }
 0x198   : > { %p449_p4 = scmp.ne.s32.totalorder %s608_s9, %s448_s20  ;;  %p453_p9 = scmp.lt.u32.totalorder %s608_s9, %s654_s3 }
 0x199   : > { %p454_p10 = scmp.lt.u32.totalorder %s452_s26, %s448_s20  ;;  %p456_p12 = scmp.lt.u32.totalorder %s448_s20, %s608_s9 }
 0x19a   : > { %p450_p7 = pnand %p449_p4, %p560_p5 }
 0x19b   : > { %p455_p11 = por %p454_p10, %p453_p9 }
 0x19c   : > { %p451_p8 = pneg %p450_p7 }
 0x19d   : > { %p457_p13 = por %p456_p12, %p455_p11 }
 0x19f   : > { %p458_p0 = pnand %p457_p13, %p451_p8 }
 0x1a1   : > { %461 = shalt.err (!%p458_p0)
}
 0x1a2   : > { %390 = dma.vmem_to_hbm [thread:$0]  (%p560_p5), %s610_s6, 128, %s608_s9, %s266_s10  }
 0x1a3 PF: > { %p396_p1 = scmp.ge.s32.totalorder %s496_s15, 2  ;;  %s291_s29 = sand.u32 1, %s484_s12  }
 0x1a4   : > { %s292_s30 = scalar_lea.sflag [#allocation3], %s291_s29 }
 0x1a5   : > { %p393_p2 = pnand %p396_p1, %p564_p6 }
 0x1a7   : > { %479 = dma.done.wait (!%p393_p2), %s292_s30, 128  }
 0x1a8   : > { %481 = vsyncadd (!%p393_p2), %s292_s30, 4294967168  ;;  %p13_p3 = scmp.ge.s32.totalorder %s547_s18, 4   ;;  %s657_s12 = smov %s488_s13 }
 0x1a9   : > { %s658_s13 = smov %s492_s14  ;;  %s659_s14 = smov %s558_s21 }
 0x1aa   : > { %s660_s15 = smov %s547_s18  ;;  %15 = sbr.rel (!%p13_p3) target bundleno = 3 (0x3), region = 67 }
 0x1b1   :  { %297 = vsyncpa [#allocation3], 1 }
 0x1b2   :  { %299 = vsyncpa [#allocation3 + $0x1], 1 }

</bundles_post_ra>
